<compile_context>
chip_gen: v7x
topology: tpu7x:2x2x1
jax: 0.10.0
libtpu: 0.0.40
codegen_flags: <defaults>
</compile_context>

<pallas_src>
from typing import NamedTuple

import jax
import jax.numpy as jnp
from jax.experimental import pallas as pl
from jax.experimental.pallas import tpu as pltpu


# --------------------------------------------------------------------------- #
# Helpers
# --------------------------------------------------------------------------- #
def _round_up(x, m):
    return (x + m - 1) // m * m


def _largest_div_tile(dim, limit, base):
    """Largest divisor of `dim` that is a multiple of `base` and <= `limit`.

    `dim` must itself be a multiple of `base`. Used so K/N tiles always divide
    the pre-packed weight extents (never re-pad W in the forward path)."""
    limit = max(base, min(limit, dim))
    units = dim // base
    best = base
    for t in range(1, units + 1):
        if units % t == 0 and t * base <= limit:
            best = t * base
    return best


def _vmem_capacity_bytes():
    try:
        return int(pltpu.get_tpu_info().vmem_capacity_bytes)
    except Exception:
        return 64 << 20  # conservative default (v7x per-TensorCore VMEM)


def _num_tensorcores():
    try:
        d = jax.devices()[0]
        nc = getattr(d, "num_cores", None)
        if nc:
            return int(nc)
        if "v7" in str(getattr(d, "device_kind", "")).lower():
            return 2
    except Exception:
        pass
    return 1


def _choose_tiles(Bp, Kp, Np, bpe_x, bpe_w, bpe_o, budget, n_cores):
    """Pick (tm, tk, tn).

    Goal: stream W from HBM exactly once (weight traffic scales with Bp/tm,
    activation traffic with Np/tn). tk / tn are always divisors of the packed
    weight extents; tm only requires cheap activation padding."""
    tm = min(Bp, 1024)
    tk = _largest_div_tile(Kp, 2048, 128)
    tn = _largest_div_tile(Np, 2048, 128)

    def ws(tm_, tk_, tn_):
        # double-buffered x / W / out blocks (+ bias block)
        return 2 * (tm_ * tk_ * bpe_x + tk_ * tn_ * bpe_w
                    + tm_ * tn_ * bpe_o + tn_ * 4)

    # Shrink in order of least HBM-traffic harm: K first (only adds grid
    # steps), then N (adds x re-reads), then M last (adds full W re-reads).
    while ws(tm, tk, tn) > budget:
        if tk > 512:
            tk = _largest_div_tile(Kp, tk // 2, 128)
        elif tn > 512:
            tn = _largest_div_tile(Np, tn // 2, 128)
        elif tm > 256:
            tm = _round_up(tm // 2, 8)
        elif tk > 128:
            tk = _largest_div_tile(Kp, tk // 2, 128)
        elif tn > 128:
            tn = _largest_div_tile(Np, tn // 2, 128)
        elif tm > 8:
            tm = _round_up(tm // 2, 8)
        else:
            break

    # Dual-TensorCore (v7x / megacore): if the grid would be single-block along
    # both parallel axes, split N (never K) so the second core gets work.
    if n_cores >= 2 and Bp // tm < 2 and Np // tn < 2 and Np >= 256:
        tn = _largest_div_tile(Np, Np // 2, 128)

    return tm, tk, tn


# --------------------------------------------------------------------------- #
# Parameter packing (done ONCE, not per forward call)
# --------------------------------------------------------------------------- #
class PackedLinear(NamedTuple):
    wt: jax.Array   # (Kp, Np) = padded (D_in, D_out), lane-major output dim
    b: jax.Array    # (1, Np) f32 padded bias
    d_in: int
    d_out: int


def pack_linear_params(weight, bias, *, use_bf16=False):
    """Transpose + pad nn.Linear params once at parameter-load time."""
    d_out, d_in = weight.shape
    kp = _round_up(d_in, 128)
    np_ = _round_up(d_out, 128)
    wt = jnp.asarray(weight).T                                  # (D_in, D_out)
    wt = jnp.pad(wt, ((0, kp - d_in), (0, np_ - d_out)))
    if use_bf16:
        wt = wt.astype(jnp.bfloat16)   # halves weight HBM traffic; f32 acc kept
    b = jnp.pad(jnp.asarray(bias, jnp.float32).reshape(1, -1),
                ((0, 0), (0, np_ - d_out)))
    return PackedLinear(wt=wt, b=b, d_in=int(d_in), d_out=int(d_out))


# --------------------------------------------------------------------------- #
# Kernels
# --------------------------------------------------------------------------- #
def _linear_single_k_kernel(x_ref, wt_ref, b_ref, o_ref):
    # One K step: single MXU matmul, bias fused into the same store.
    acc = jnp.dot(x_ref[...], wt_ref[...], preferred_element_type=jnp.float32)
    o_ref[...] = (acc + b_ref[...].astype(jnp.float32)).astype(o_ref.dtype)


def _linear_multi_k_f32_kernel(x_ref, wt_ref, b_ref, o_ref):
    # f32 output: accumulate directly into the resident output block (its
    # index_map ignores k) - no scratch, bias folded into the k==0 init.
    k = pl.program_id(2)

    @pl.when(k == 0)
    def _init():
        o_ref[...] = jnp.broadcast_to(b_ref[...], o_ref.shape)

    o_ref[...] += jnp.dot(x_ref[...], wt_ref[...],
                          preferred_element_type=jnp.float32)


def _linear_multi_k_acc_kernel(x_ref, wt_ref, b_ref, o_ref, acc_ref):
    # Non-f32 output: f32 VMEM accumulator, single cast at the last K step.
    k = pl.program_id(2)

    @pl.when(k == 0)
    def _init():
        acc_ref[...] = jnp.broadcast_to(b_ref[...].astype(jnp.float32),
                                        acc_ref.shape)

    acc_ref[...] += jnp.dot(x_ref[...], wt_ref[...],
                            preferred_element_type=jnp.float32)

    @pl.when(k == pl.num_programs(2) - 1)
    def _fin():
        o_ref[...] = acc_ref[...].astype(o_ref.dtype)


# --------------------------------------------------------------------------- #
# Forward
# --------------------------------------------------------------------------- #
def linear_regression_forward(x, params: PackedLinear):
    """y = x @ W.T + b using pre-packed parameters."""
    wt, b, d_in, d_out = params
    assert x.shape[-1] == d_in
    out_dtype = x.dtype

    lead = x.shape[:-1]
    x2 = x.reshape(-1, d_in)
    B = x2.shape[0]

    # Match activation compute dtype to the packed weight (bf16 option).
    x_in = x2.astype(wt.dtype) if x2.dtype != wt.dtype else x2

    Kp, Np = wt.shape
    bpe_x = jnp.dtype(x_in.dtype).itemsize
    bpe_w = jnp.dtype(wt.dtype).itemsize
    bpe_o = jnp.dtype(out_dtype).itemsize

    vmem_cap = _vmem_capacity_bytes()
    n_cores = _num_tensorcores()
    budget = int(vmem_cap * 0.6)
    vmem_limit = int(vmem_cap * 3 // 4)   # ~48 MiB on v7x, ~96 MiB on v5e/v6e

    Bp = _round_up(B, 8)
    tm, tk, tn = _choose_tiles(Bp, Kp, Np, bpe_x, bpe_w, bpe_o, budget, n_cores)
    Bp = _round_up(Bp, tm)

    n_k = Kp // tk
    grid_m = Bp // tm
    grid_n = Np // tn

    cost = pl.CostEstimate(
        flops=2 * B * d_in * d_out,
        transcendentals=0,
        bytes_accessed=(B * d_in * bpe_x + d_in * d_out * bpe_w
                        + d_out * 4 + B * d_out * bpe_o),
    )

    if n_k == 1:
        # Fast path: single K step -> no K grid axis, no accumulator, no
        # pl.when. If D_in is sublane-aligned, read x unpadded along K (block
        # dim == full array dim is legal) and only touch the first D_in rows
        # of the packed weight.
        k_blk = d_in if d_in % 8 == 0 else Kp
        pad_m, pad_k = Bp - B, k_blk - d_in
        xp = jnp.pad(x_in, ((0, pad_m), (0, pad_k))) if (pad_m or pad_k) else x_in

        out_padded = pl.pallas_call(
            _linear_single_k_kernel,
            out_shape=jax.ShapeDtypeStruct((Bp, Np), out_dtype),
            grid=(grid_m, grid_n),
            in_specs=[
                pl.BlockSpec((tm, k_blk), lambda i, j: (i, 0)),
                pl.BlockSpec((k_blk, tn), lambda i, j: (0, j)),
                pl.BlockSpec((1, tn), lambda i, j: (0, j)),
            ],
            out_specs=pl.BlockSpec((tm, tn), lambda i, j: (i, j)),
            compiler_params=pltpu.CompilerParams(
                dimension_semantics=("parallel", "parallel"),
                vmem_limit_bytes=vmem_limit,
            ),
            cost_estimate=cost,
        )(xp, wt, b)
    else:
        pad_m, pad_k = Bp - B, Kp - d_in
        xp = jnp.pad(x_in, ((0, pad_m), (0, pad_k))) if (pad_m or pad_k) else x_in

        w_map = lambda i, j, k: (k, j)
        w_spec = pl.BlockSpec((tk, tn), w_map)
        # Deeper weight-stream buffering on v5e/v6e-class VMEM when headroom
        # exists (hides exposed DMA on the K stream).
        ws_bytes = 2 * (tm * tk * bpe_x + tk * tn * bpe_w
                        + tm * tn * bpe_o + tn * 4)
        if (vmem_cap >= (100 << 20) and n_k > 2
                and ws_bytes + tk * tn * bpe_w <= budget):
            try:
                w_spec = pl.BlockSpec((tk, tn), w_map,
                                      pipeline_mode=pl.Buffered(3))
            except TypeError:
                pass

        fused_f32 = (out_dtype == jnp.float32)
        kernel = (_linear_multi_k_f32_kernel if fused_f32
                  else _linear_multi_k_acc_kernel)
        scratch = [] if fused_f32 else [pltpu.VMEM((tm, tn), jnp.float32)]

        out_padded = pl.pallas_call(
            kernel,
            out_shape=jax.ShapeDtypeStruct((Bp, Np), out_dtype),
            grid=(grid_m, grid_n, n_k),
            in_specs=[
                pl.BlockSpec((tm, tk), lambda i, j, k: (i, k)),
                w_spec,
                pl.BlockSpec((1, tn), lambda i, j, k: (0, j)),
            ],
            out_specs=pl.BlockSpec((tm, tn), lambda i, j, k: (i, j)),
            scratch_shapes=scratch,
            compiler_params=pltpu.CompilerParams(
                dimension_semantics=("parallel", "parallel", "arbitrary"),
                vmem_limit_bytes=vmem_limit,
            ),
            cost_estimate=cost,
        )(xp, wt, b)

    out = out_padded[:B, :d_out]
    return out.reshape(*lead, d_out)


# --------------------------------------------------------------------------- #
# Self-test
# --------------------------------------------------------------------------- #
if __name__ == "__main__":
    batch, input_dim, output_dim = 8, 32, 16

    key = jax.random.PRNGKey(0)
    kx, kw, kb = jax.random.split(key, 3)

    # Deterministic init mirroring nn.Linear's uniform(-1/sqrt(in), 1/sqrt(in)).
    bound = 1.0 / jnp.sqrt(jnp.float32(input_dim))
    weight = jax.random.uniform(kw, (output_dim, input_dim), jnp.float32,
                                -bound, bound)
    bias = jax.random.uniform(kb, (output_dim,), jnp.float32, -bound, bound)
    x = jax.random.normal(kx, (batch, input_dim), jnp.float32)

    params = pack_linear_params(weight, bias)   # packed ONCE (not per forward)
    out = linear_regression_forward(x, params)
    jax.block_until_ready(out)

    # Reference check against plain JAX.
    ref = x @ weight.T + bias
    assert out.shape == (batch, output_dim)
    assert jnp.allclose(out, ref, atol=1e-5, rtol=1e-5)

    print("KERNEL_OK")
</pallas_src>

<mosaic_0001>
module attributes {stable_mosaic.version = 11 : i64} {
  func.func @_linear_single_k_kernel(%arg0: i32, %arg1: i32, %arg2: memref<8x32xf32, #tpu.memory_space<vmem>>, %arg3: memref<32x128xf32, #tpu.memory_space<vmem>>, %arg4: memref<1x128xf32, #tpu.memory_space<vmem>>, %arg5: memref<8x128xf32, #tpu.memory_space<vmem>>) attributes {dimension_semantics = [#tpu.dimension_semantics<parallel>, #tpu.dimension_semantics<parallel>], iteration_bounds = array<i64: 1, 1>, scalar_prefetch = 0 : i64, scratch_operands = 0 : i64, tpu.core_type = #tpu.core_type<tc>, window_params = [{transform_indices = @transform_0, window_bounds = array<i64: 8, 32>}, {transform_indices = @transform_1, window_bounds = array<i64: 32, 128>}, {transform_indices = @transform_2, window_bounds = array<i64: 1, 128>}, {transform_indices = @transform_3, window_bounds = array<i64: 8, 128>}]} {
    %c0 = arith.constant 0 : index
    %c0_0 = arith.constant 0 : index
    %0 = vector.load %arg2[%c0, %c0_0] : memref<8x32xf32, #tpu.memory_space<vmem>>, vector<8x32xf32>
    %c0_1 = arith.constant 0 : index
    %c0_2 = arith.constant 0 : index
    %1 = vector.load %arg3[%c0_1, %c0_2] : memref<32x128xf32, #tpu.memory_space<vmem>>, vector<32x128xf32>
    %cst = arith.constant dense<0.000000e+00> : vector<8x128xf32>
    %2 = tpu.matmul %0, %1, %cst {dimension_numbers = #tpu.dot_dimension_numbers<[1], [0], [0], [1], [0, 0, 1, 1], [], []>} : vector<8x32xf32>, vector<32x128xf32>, vector<8x128xf32> -> vector<8x128xf32>
    %c0_3 = arith.constant 0 : index
    %c0_4 = arith.constant 0 : index
    %3 = vector.load %arg4[%c0_3, %c0_4] : memref<1x128xf32, #tpu.memory_space<vmem>>, vector<1x128xf32>
    %4 = vector.broadcast %3 : vector<1x128xf32> to vector<8x128xf32>
    %5 = arith.addf %2, %4 : vector<8x128xf32>
    %c0_5 = arith.constant 0 : index
    %c0_6 = arith.constant 0 : index
    %6 = vector.load %arg5[%c0_5, %c0_6] : memref<8x128xf32, #tpu.memory_space<vmem>>, vector<8x128xf32>
    tpu.vector_store %arg5[%c0_5, %c0_6], %5 {strides = array<i32>} : memref<8x128xf32, #tpu.memory_space<vmem>>, vector<8x128xf32>,
    return
  }
  func.func @transform_0(%arg0: i32, %arg1: i32) -> (i32, i32) {
    %c0_i32 = arith.constant 0 : i32
    %c0_i32_0 = arith.constant 0 : i32
    return %arg0, %c0_i32 : i32, i32
  }
  func.func @transform_1(%arg0: i32, %arg1: i32) -> (i32, i32) {
    %c0_i32 = arith.constant 0 : i32
    %c0_i32_0 = arith.constant 0 : i32
    return %c0_i32, %arg1 : i32, i32
  }
  func.func @transform_2(%arg0: i32, %arg1: i32) -> (i32, i32) {
    %c0_i32 = arith.constant 0 : i32
    %c0_i32_0 = arith.constant 0 : i32
    return %c0_i32, %arg1 : i32, i32
  }
  func.func @transform_3(%arg0: i32, %arg1: i32) -> (i32, i32) {
    %c0_i32 = arith.constant 0 : i32
    return %arg0, %arg1 : i32, i32
  }
}

</mosaic_0001>

<bundles_post_ra>
// kernel: tpu_custom_call.1
= control target key start
LH: loop header
LB: loop body
LE: loop exit
PB: predicated region body
PF: predicated region fallthrough
CT: control target
= control target key end

     0   :  { %8 = vsyncpa [#allocation3], 0  ;;  %s325_s0 = inlined_call_operand.hbm [shape: f32[8,32], index: 0, kind: input, shape index: {}]   ;;  %s326_s1 = inlined_call_operand.hbm [shape: f32[128,128], index: 1, kind: input, shape index: {}]   ;;  %s327_s2 = inlined_call_operand.vmem [shape: f32[1,128], index: 2, kind: input, shape index: {}]   ;;  %s328_s3 = inlined_call_operand.hbm [shape: f32[8,128], index: 3, kind: output, shape index: {}]  }
   0x1   :  { %9 = vsyncpa [#allocation6], 0 }
   0x2   :  { %10 = vsyncpa [#allocation4], 0  ;;  %s248_s12 = smov [#allocation2]   ;;  %s249_s14 = smov [#allocation5]  }
   0x3   :  { %s17_s13 = sshll.u32 %s248_s12, 4  ;;  %s26_s15 = sshll.u32 %s249_s14, 4  ;;  %s18_s13 = int_to_ptr.vmem [resolvable:$true] %s17_s13  ;;  %s276_s15 = int_to_ptr.vmem [resolvable:$true] %s26_s15 }
   0x4   :  { %s176_s18 = scalar_lea.hbm %s325_s0, 128 }
   0x5   :  { %p177_p0 = scmp.ne.s32.totalorder %s325_s0, %s176_s18  ;;  %p180_p1 = scmp.lt.u32.totalorder %s176_s18, %s325_s0 }
   0x7   :  { %p182_p2 = pnand %p180_p1, %p177_p0 }
   0x9   :  { %185 = shalt.err (!%p182_p2)
}
   0xa   :  { %s186_s23 = scalar_lea.vmem %s18_s13, 128  ;;  %p191_p4 = scmp.lt.s32.totalorder %s18_s13, %s18_s13 }
   0xb   :  { %p187_p3 = scmp.ne.s32.totalorder %s18_s13, %s186_s23  ;;  %p192_p5 = scmp.lt.s32.totalorder %s186_s23, %s186_s23 }
   0xd   :  { %p193_p6 = por %p192_p5, %p191_p4 }
   0xf   :  { %p194_p7 = pnand %p193_p6, %p187_p3 }
  0x11   :  { %197 = shalt.err (!%p194_p7)
}
  0x12   :  { %20 = dma.hbm_to_vmem [thread:$0]  %s325_s0, 128, %s18_s13, [#allocation3]  }
  0x13   :  { %s198_s28 = scalar_lea.hbm %s326_s1, 512  ;;  %s200_s6 = scalar_lea.hbm %s326_s1, 2048 }
  0x14   :  { %p199_p8 = scmp.ne.s32.totalorder %s326_s1, %s198_s28  ;;  %p201_p9 = scmp.lt.u32.totalorder %s200_s6, %s198_s28 }
  0x15   :  { %p202_p10 = scmp.lt.u32.totalorder %s198_s28, %s326_s1 }
  0x17   :  { %p203_p11 = por %p202_p10, %p201_p9 }
  0x19   :  { %p204_p12 = pnand %p203_p11, %p199_p8 }
  0x1b   :  { %207 = shalt.err (!%p204_p12)
}
  0x1c   :  { %s208_s0 = scalar_lea.vmem %s276_s15, 512  ;;  %p213_p0 = scmp.lt.s32.totalorder %s276_s15, %s276_s15 }
  0x1d   :  { %p209_p13 = scmp.ne.s32.totalorder %s276_s15, %s208_s0  ;;  %p214_p1 = scmp.lt.s32.totalorder %s208_s0, %s208_s0 }
  0x1f   :  { %p215_p2 = por %p214_p1, %p213_p0 }
  0x21   :  { %p216_p3 = pnand %p215_p2, %p209_p13 }
  0x23   :  { %219 = shalt.err (!%p216_p3)
}
  0x24   :  { %s250_s9 = smov 128   ;;  %s251_s10 = smov 8  }
  0x25   :  { %32 = dma.hbm_to_vmem [thread:$0]  %s326_s1, 512, %s276_s15, [#allocation6], %s250_s9, %s250_s9, %s251_s10  }
  0x26   :  { %242 = dma.done.wait [#allocation3], 128  }
  0x27   :  { %243 = vsyncadd [#allocation3], 4294967168 }
  0x28   :  { %244 = dma.done.wait [#allocation6], 512  }
  0x29   :  { %245 = vsyncadd [#allocation6], 4294966784  ;;  %v252_v0 = vmov 0.0|0.0   ;;  %vm253_vm0 = vmmov 0   ;;  %v254_v1 = vmov 0.0   ;;  %v42_v2 = vld [vmem:[#allocation5] sm:$0xff] }
  0x2a   :  { %162 = vmatprep.subr.bf16.mxu0 %v252_v0  ;;  %159 = vmatprep.mubr.msk.f32.mxu0 %vm253_vm0, %v254_v1  ;;  %v43_v3 = vld [vmem:[#allocation5 + $0x8] sm:$0xff]  ;;  %v44_v4 = vld [vmem:[#allocation5 + $0x10] sm:$0xff]  ;;  %v45_v6 = vld [vmem:[#allocation5 + $0x18] sm:$0xff]  ;;  %vm53_vm1 = vcmask 261120   ;;  %s255_s14 = smov [#allocation7]  }
  0x2b   :  { %v163_v5 = vpack.c.bf16 %v43_v3, %v42_v2  ;;  %v166_v7 = vpack.c.bf16 %v45_v6, %v44_v4  ;;  %v41_v8 = vld [vmem:[#allocation2] sm:$0xff]  ;;  %s134_s15 = sshll.u32 %s255_s14, 4  ;;  %s135_s15 = int_to_ptr.vmem [resolvable:$true] %s134_s15 }
  0x2c   :  { %v144_v9 = vld [vmem:[%s327_s2] ss:$0 sm:$0xff]  ;;  %s220_s16 = scalar_lea.vmem %s135_s15, 128  ;;  %p225_p5 = scmp.lt.s32.totalorder %s135_s15, %s135_s15 }
  0x2d   :  { %164 = vmatpush3.bf16.msra.mxu0 %v163_v5  ;;  %p221_p4 = scmp.ne.s32.totalorder %s135_s15, %s220_s16  ;;  %p226_p6 = scmp.lt.s32.totalorder %s220_s16, %s220_s16 }
  0x2e   :  { %165 = vmatprep.subr.bf16.mxu0 %v252_v0 }
  0x2f   :  { %p227_p7 = por %p226_p6, %p225_p5 }
  0x31   :  { %167 = vmatpush3.bf16.msra.mxu0 %v166_v7  ;;  %p228_p8 = pnand %p227_p7, %p221_p4 }
  0x34   :  { %160 = vmatmul.mubr.msk.f32.vlgmr.msra.gmra.mrb[0].mxu0 %vm53_vm1, %v41_v8 }
 0x107   :  { %v123_v10 = vpop.f32.mrb[0].mxu0 }
 0x108   :  { %v124_v11 = vadd.f32 %v144_v9, %v123_v10  ;;  %v161_v12 = vpop.f32.mrb[1].mxu0 }
 0x10a   :  { %127 = vst [vmem:[#allocation7] sm:$0xff] %v124_v11 }
 0x10b   :  { %231 = shalt.err (!%p228_p8)
}
 0x10c   :  { %s232_s19 = scalar_lea.hbm %s328_s3, 128 }
 0x10d   :  { %p233_p9 = scmp.ne.s32.totalorder %s328_s3, %s232_s19  ;;  %p236_p10 = scmp.lt.u32.totalorder %s232_s19, %s328_s3 }
 0x10f   :  { %p238_p11 = pnand %p236_p10, %p233_p9 }
 0x111   :  { %241 = shalt.err (!%p238_p11)
}
 0x112   :  { %137 = dma.vmem_to_hbm [thread:$0]  %s135_s15, 128, %s328_s3, [#allocation4]  }
 0x113   :  { %246 = dma.done.wait [#allocation4], 128  }
 0x114   :  { %247 = vsyncadd [#allocation4], 4294967168 }
 0x115   :  { %141 = vsyncpa [#allocation3], 1 }
 0x116   :  { %142 = vsyncpa [#allocation6], 1 }
 0x117   :  { %143 = vsyncpa [#allocation4], 1 }

</bundles_post_ra>
